<compile_context>
chip_gen: v7x
topology: tpu7x:2x2x1
jax: 0.10.0
libtpu: 0.0.40
codegen_flags: <defaults>
</compile_context>

<pallas_src>
import numpy as np

import jax
import jax.numpy as jnp
from jax.experimental import pallas as pl
from jax.experimental.pallas import tpu as pltpu


# ----------------------------------------------------------------------------
# Host-side (static) interpolation weight matrices.
# ----------------------------------------------------------------------------
def _bilinear_matrix(in_size: int, out_size: int) -> np.ndarray:
    """(out_size, in_size) bilinear interpolation matrix, half-pixel centers
    (torchvision tensor bilinear, align_corners=False, antialias=False)."""
    w = np.zeros((out_size, in_size), dtype=np.float32)
    if out_size == in_size:
        np.fill_diagonal(w, 1.0)
        return w
    scale = in_size / out_size
    for i in range(out_size):
        src = (i + 0.5) * scale - 0.5
        if src < 0.0:  # PyTorch clamps negative source coords to 0
            src = 0.0
        y0 = int(np.floor(src))
        dy = src - y0
        y0c = min(max(y0, 0), in_size - 1)
        y1c = min(max(y0 + 1, 0), in_size - 1)
        w[i, y0c] += 1.0 - dy
        w[i, y1c] += dy
    return w


def _nearest_matrix(in_size: int, out_size: int) -> np.ndarray:
    """(out_size, in_size) one-hot nearest-neighbour selection matrix
    (PyTorch tensor 'nearest': src = floor(i * in / out))."""
    w = np.zeros((out_size, in_size), dtype=np.float32)
    for i in range(out_size):
        src = min(int(np.floor(i * in_size / out_size)), in_size - 1)
        w[i, src] = 1.0
    return w


# ----------------------------------------------------------------------------
# Pallas kernel factory: one image + one label map per grid step.
# ----------------------------------------------------------------------------
def _make_resize_pair_kernel(C, H, W, out_h, out_w, width_first):
    def kernel(wy_ref, wxt_ref, sy_ref, sxt_ref,
               img_ref, tgt_ref, img_out_ref, tgt_out_ref):
        # img_ref: (C, H, W)            wy:  (out_h, H)   wxt: (W, out_w)
        # tgt_ref: (H, W) int32         sy:  (out_h, H)   sxt: (W, out_w)  (one-hot)
        wy = wy_ref[...]
        wxt = wxt_ref[...]
        img = img_ref[...].astype(jnp.float32)              # (C, H, W)

        if width_first:
            # Width pass fused across channels: one MXU matmul with M = C*H.
            # The (C, H, W) -> (C*H, W) reshape is layout-free when H % 8 == 0.
            tmp = jnp.dot(img.reshape(C * H, W), wxt,
                          preferred_element_type=jnp.float32)          # (C*H, out_w)
            for c in range(C):
                img_out_ref[c] = jnp.dot(
                    wy, tmp[c * H:(c + 1) * H, :],
                    preferred_element_type=jnp.float32).astype(img_out_ref.dtype)
        else:
            # Height pass first (cheaper when downscaling rows), then width pass.
            for c in range(C):
                rows_c = jnp.dot(wy, img[c],
                                 preferred_element_type=jnp.float32)   # (out_h, W)
                img_out_ref[c] = jnp.dot(
                    rows_c, wxt,
                    preferred_element_type=jnp.float32).astype(img_out_ref.dtype)

        # Nearest-neighbour target resize via one-hot selection matmuls;
        # products are label * {0,1} so the result is exact for integer labels.
        t = tgt_ref[...].astype(jnp.float32)                            # (H, W)
        sy = sy_ref[...]
        sxt = sxt_ref[...]
        if width_first:
            out_t = jnp.dot(sy,
                            jnp.dot(t, sxt, preferred_element_type=jnp.float32),
                            preferred_element_type=jnp.float32)
        else:
            out_t = jnp.dot(jnp.dot(sy, t, preferred_element_type=jnp.float32),
                            sxt, preferred_element_type=jnp.float32)
        tgt_out_ref[...] = jnp.round(out_t).astype(tgt_out_ref.dtype)

    return kernel


# ----------------------------------------------------------------------------
# Wrapper: draws the random scale (host-side, like the original module), builds
# the static weight matrices and launches one pallas_call over the batch.
# ----------------------------------------------------------------------------
def random_resize_pair(image, target, min_scale, max_scale, base_size=None,
                       *, key=None, resize_scale=None):
    """image: (N, C, H, W) float32; target: (N, H, W) int32.

    Returns (resized_image, resized_target, resize_scale)."""
    N, C, H, W = image.shape
    assert target.shape == (N, H, W)

    if resize_scale is None:
        if key is None:
            key = jax.random.PRNGKey(0)
        # Host-side random draw, mirroring np.random.random_sample() in torch.
        u = float(jax.random.uniform(key, ()))
        resize_scale = u * (max_scale - min_scale) + min_scale
    base_h, base_w = base_size if base_size is not None else (H, W)
    out_h = max(int(base_h * resize_scale), 1)
    out_w = max(int(base_w * resize_scale), 1)

    wy = jnp.asarray(_bilinear_matrix(H, out_h))           # (out_h, H)
    wxt = jnp.asarray(_bilinear_matrix(W, out_w).T)        # (W, out_w)
    sy = jnp.asarray(_nearest_matrix(H, out_h))            # (out_h, H)
    sxt = jnp.asarray(_nearest_matrix(W, out_w).T)         # (W, out_w)

    # Static pass-order choice: run the cheaper separable contraction first.
    #   width-first FLOPs  ~ C*H*out_w*(W + out_h)
    #   height-first FLOPs ~ C*out_h*W*(H + out_w)
    width_first = H * out_w * (W + out_h) <= out_h * W * (H + out_w)

    kernel = _make_resize_pair_kernel(C, H, W, out_h, out_w, width_first)

    img_out, tgt_out = pl.pallas_call(
        kernel,
        out_shape=(
            jax.ShapeDtypeStruct((N, C, out_h, out_w), image.dtype),
            jax.ShapeDtypeStruct((N, out_h, out_w), target.dtype),
        ),
        grid=(N,),
        in_specs=[
            pl.BlockSpec((out_h, H), lambda b: (0, 0)),              # Wy
            pl.BlockSpec((W, out_w), lambda b: (0, 0)),              # Wx^T
            pl.BlockSpec((out_h, H), lambda b: (0, 0)),              # Sy
            pl.BlockSpec((W, out_w), lambda b: (0, 0)),              # Sx^T
            pl.BlockSpec((None, C, H, W), lambda b: (b, 0, 0, 0)),   # image
            pl.BlockSpec((None, H, W), lambda b: (b, 0, 0)),         # target
        ],
        out_specs=[
            pl.BlockSpec((None, C, out_h, out_w), lambda b: (b, 0, 0, 0)),
            pl.BlockSpec((None, out_h, out_w), lambda b: (b, 0, 0)),
        ],
        compiler_params=pltpu.CompilerParams(
            dimension_semantics=("parallel",),      # shard batch across TCs (v7x)
            vmem_limit_bytes=64 * 1024 * 1024,      # explicit scoped-VMEM budget
        ),
    )(wy, wxt, sy, sxt, image, target)

    return img_out, tgt_out, resize_scale


if __name__ == "__main__":
    # Module hyper-parameters (values used by composer's ADE20k pipeline).
    min_scale, max_scale = 0.5, 2.0

    key = jax.random.PRNGKey(0)
    k_img, k_tgt, k_scale = jax.random.split(key, 3)

    N, C, H, W = 2, 3, 16, 16
    image = jax.random.uniform(k_img, (N, C, H, W), dtype=jnp.float32)
    # ADE20k-style label map (150 classes + background).
    target = jax.random.randint(k_tgt, (N, H, W), 0, 151, dtype=jnp.int32)

    resized_image, resized_target, scale = random_resize_pair(
        image, target, min_scale, max_scale, base_size=None, key=k_scale)
    jax.block_until_ready((resized_image, resized_target))

    # Reference check using the same (numpy) weight matrices.
    out_h, out_w = resized_image.shape[2], resized_image.shape[3]
    wy_np = _bilinear_matrix(H, out_h)
    wx_np = _bilinear_matrix(W, out_w)
    sy_np = _nearest_matrix(H, out_h)
    sx_np = _nearest_matrix(W, out_w)

    img_np = np.asarray(image)
    tgt_np = np.asarray(target)
    ref_img = np.einsum("oh,nchw,pw->ncop", wy_np, img_np, wx_np)
    ref_tgt = np.rint(
        np.einsum("oh,nhw,pw->nop", sy_np, tgt_np.astype(np.float32), sx_np)
    ).astype(np.int32)

    np.testing.assert_allclose(np.asarray(resized_image), ref_img, atol=2e-2)
    assert np.array_equal(np.asarray(resized_target), ref_tgt)

    print("KERNEL_OK")
</pallas_src>

<mosaic_0001>
module attributes {stable_mosaic.version = 11 : i64} {
  func.func @kernel(%arg0: i32, %arg1: memref<29x16xf32, #tpu.memory_space<vmem>>, %arg2: memref<16x29xf32, #tpu.memory_space<vmem>>, %arg3: memref<29x16xf32, #tpu.memory_space<vmem>>, %arg4: memref<16x29xf32, #tpu.memory_space<vmem>>, %arg5: memref<1x3x16x16xf32, #tpu.memory_space<vmem>>, %arg6: memref<1x16x16xi32, #tpu.memory_space<vmem>>, %arg7: memref<1x3x29x29xf32, #tpu.memory_space<vmem>>, %arg8: memref<1x29x29xi32, #tpu.memory_space<vmem>>) attributes {dimension_semantics = [#tpu.dimension_semantics<parallel>], iteration_bounds = array<i64: 2>, scalar_prefetch = 0 : i64, scratch_operands = 0 : i64, tpu.core_type = #tpu.core_type<tc>, window_params = [{pipeline_mode = #tpu.pipeline_mode<synchronous>, transform_indices = @transform_0, window_bounds = array<i64: 29, 16>}, {pipeline_mode = #tpu.pipeline_mode<synchronous>, transform_indices = @transform_1, window_bounds = array<i64: 16, 29>}, {pipeline_mode = #tpu.pipeline_mode<synchronous>, transform_indices = @transform_2, window_bounds = array<i64: 29, 16>}, {pipeline_mode = #tpu.pipeline_mode<synchronous>, transform_indices = @transform_3, window_bounds = array<i64: 16, 29>}, {transform_indices = @transform_4, window_bounds = array<i64: 1, 3, 16, 16>}, {transform_indices = @transform_5, window_bounds = array<i64: 1, 16, 16>}, {transform_indices = @transform_6, window_bounds = array<i64: 1, 3, 29, 29>}, {transform_indices = @transform_7, window_bounds = array<i64: 1, 29, 29>}]} {
    %c0 = arith.constant 0 : index
    %c0_0 = arith.constant 0 : index
    %0 = vector.load %arg1[%c0, %c0_0] : memref<29x16xf32, #tpu.memory_space<vmem>>, vector<29x16xf32>
    %c0_1 = arith.constant 0 : index
    %c0_2 = arith.constant 0 : index
    %1 = vector.load %arg2[%c0_1, %c0_2] : memref<16x29xf32, #tpu.memory_space<vmem>>, vector<16x29xf32>
    %c0_3 = arith.constant 0 : index
    %c0_4 = arith.constant 0 : index
    %c0_5 = arith.constant 0 : index
    %c0_6 = arith.constant 0 : index
    %2 = vector.load %arg5[%c0_3, %c0_4, %c0_5, %c0_6] : memref<1x3x16x16xf32, #tpu.memory_space<vmem>>, vector<1x3x16x16xf32>
    %3 = vector.shape_cast %2 : vector<1x3x16x16xf32> to vector<3x16x16xf32>
    %4 = vector.shape_cast %3 : vector<3x16x16xf32> to vector<48x16xf32>
    %cst = arith.constant dense<0.000000e+00> : vector<48x29xf32>
    %5 = tpu.matmul %4, %1, %cst {dimension_numbers = #tpu.dot_dimension_numbers<[1], [0], [0], [1], [0, 0, 1, 1], [], []>} : vector<48x16xf32>, vector<16x29xf32>, vector<48x29xf32> -> vector<48x29xf32>
    %6 = vector.extract_strided_slice %5 {offsets = [0, 0], sizes = [16, 29], strides = [1, 1]} : vector<48x29xf32> to vector<16x29xf32>
    %cst_7 = arith.constant dense<0.000000e+00> : vector<29x29xf32>
    %7 = tpu.matmul %0, %6, %cst_7 {dimension_numbers = #tpu.dot_dimension_numbers<[1], [0], [0], [1], [0, 0, 1, 1], [], []>} : vector<29x16xf32>, vector<16x29xf32>, vector<29x29xf32> -> vector<29x29xf32>
    %c0_8 = arith.constant 0 : index
    %c0_9 = arith.constant 0 : index
    %c0_10 = arith.constant 0 : index
    %c0_11 = arith.constant 0 : index
    %8 = vector.load %arg7[%c0_8, %c0_9, %c0_10, %c0_11] : memref<1x3x29x29xf32, #tpu.memory_space<vmem>>, vector<1x1x29x29xf32>
    %9 = vector.shape_cast %8 : vector<1x1x29x29xf32> to vector<29x29xf32>
    %10 = vector.shape_cast %7 : vector<29x29xf32> to vector<1x1x29x29xf32>
    tpu.vector_store %arg7[%c0_8, %c0_9, %c0_10, %c0_11], %10 {strides = array<i32>} : memref<1x3x29x29xf32, #tpu.memory_space<vmem>>, vector<1x1x29x29xf32>,
    %11 = vector.extract_strided_slice %5 {offsets = [16, 0], sizes = [16, 29], strides = [1, 1]} : vector<48x29xf32> to vector<16x29xf32>
    %cst_12 = arith.constant dense<0.000000e+00> : vector<29x29xf32>
    %12 = tpu.matmul %0, %11, %cst_12 {dimension_numbers = #tpu.dot_dimension_numbers<[1], [0], [0], [1], [0, 0, 1, 1], [], []>} : vector<29x16xf32>, vector<16x29xf32>, vector<29x29xf32> -> vector<29x29xf32>
    %c0_13 = arith.constant 0 : index
    %c1 = arith.constant 1 : index
    %c0_14 = arith.constant 0 : index
    %c0_15 = arith.constant 0 : index
    %13 = vector.load %arg7[%c0_13, %c1, %c0_14, %c0_15] : memref<1x3x29x29xf32, #tpu.memory_space<vmem>>, vector<1x1x29x29xf32>
    %14 = vector.shape_cast %13 : vector<1x1x29x29xf32> to vector<29x29xf32>
    %15 = vector.shape_cast %12 : vector<29x29xf32> to vector<1x1x29x29xf32>
    tpu.vector_store %arg7[%c0_13, %c1, %c0_14, %c0_15], %15 {strides = array<i32>} : memref<1x3x29x29xf32, #tpu.memory_space<vmem>>, vector<1x1x29x29xf32>,
    %16 = vector.extract_strided_slice %5 {offsets = [32, 0], sizes = [16, 29], strides = [1, 1]} : vector<48x29xf32> to vector<16x29xf32>
    %cst_16 = arith.constant dense<0.000000e+00> : vector<29x29xf32>
    %17 = tpu.matmul %0, %16, %cst_16 {dimension_numbers = #tpu.dot_dimension_numbers<[1], [0], [0], [1], [0, 0, 1, 1], [], []>} : vector<29x16xf32>, vector<16x29xf32>, vector<29x29xf32> -> vector<29x29xf32>
    %c0_17 = arith.constant 0 : index
    %c2 = arith.constant 2 : index
    %c0_18 = arith.constant 0 : index
    %c0_19 = arith.constant 0 : index
    %18 = vector.load %arg7[%c0_17, %c2, %c0_18, %c0_19] : memref<1x3x29x29xf32, #tpu.memory_space<vmem>>, vector<1x1x29x29xf32>
    %19 = vector.shape_cast %18 : vector<1x1x29x29xf32> to vector<29x29xf32>
    %20 = vector.shape_cast %17 : vector<29x29xf32> to vector<1x1x29x29xf32>
    tpu.vector_store %arg7[%c0_17, %c2, %c0_18, %c0_19], %20 {strides = array<i32>} : memref<1x3x29x29xf32, #tpu.memory_space<vmem>>, vector<1x1x29x29xf32>,
    %c0_20 = arith.constant 0 : index
    %c0_21 = arith.constant 0 : index
    %c0_22 = arith.constant 0 : index
    %21 = vector.load %arg6[%c0_20, %c0_21, %c0_22] : memref<1x16x16xi32, #tpu.memory_space<vmem>>, vector<1x16x16xi32>
    %22 = vector.shape_cast %21 : vector<1x16x16xi32> to vector<16x16xi32>
    %23 = arith.sitofp %22 : vector<16x16xi32> to vector<16x16xf32>
    %c0_23 = arith.constant 0 : index
    %c0_24 = arith.constant 0 : index
    %24 = vector.load %arg3[%c0_23, %c0_24] : memref<29x16xf32, #tpu.memory_space<vmem>>, vector<29x16xf32>
    %c0_25 = arith.constant 0 : index
    %c0_26 = arith.constant 0 : index
    %25 = vector.load %arg4[%c0_25, %c0_26] : memref<16x29xf32, #tpu.memory_space<vmem>>, vector<16x29xf32>
    %cst_27 = arith.constant dense<0.000000e+00> : vector<16x29xf32>
    %26 = tpu.matmul %23, %25, %cst_27 {dimension_numbers = #tpu.dot_dimension_numbers<[1], [0], [0], [1], [0, 0, 1, 1], [], []>} : vector<16x16xf32>, vector<16x29xf32>, vector<16x29xf32> -> vector<16x29xf32>
    %cst_28 = arith.constant dense<0.000000e+00> : vector<29x29xf32>
    %27 = tpu.matmul %24, %26, %cst_28 {dimension_numbers = #tpu.dot_dimension_numbers<[1], [0], [0], [1], [0, 0, 1, 1], [], []>} : vector<29x16xf32>, vector<16x29xf32>, vector<29x29xf32> -> vector<29x29xf32>
    %28 = math.roundeven %27 : vector<29x29xf32>
    %29 = arith.fptosi %28 : vector<29x29xf32> to vector<29x29xi32>
    %c0_29 = arith.constant 0 : index
    %c0_30 = arith.constant 0 : index
    %c0_31 = arith.constant 0 : index
    %30 = vector.load %arg8[%c0_29, %c0_30, %c0_31] : memref<1x29x29xi32, #tpu.memory_space<vmem>>, vector<1x29x29xi32>
    %31 = vector.shape_cast %30 : vector<1x29x29xi32> to vector<29x29xi32>
    %32 = vector.shape_cast %29 : vector<29x29xi32> to vector<1x29x29xi32>
    tpu.vector_store %arg8[%c0_29, %c0_30, %c0_31], %32 {strides = array<i32>} : memref<1x29x29xi32, #tpu.memory_space<vmem>>, vector<1x29x29xi32>,
    return
  }
  func.func @transform_0(%arg0: i32) -> (i32, i32) {
    %c0_i32 = arith.constant 0 : i32
    %c0_i32_0 = arith.constant 0 : i32
    %c0_i32_1 = arith.constant 0 : i32
    return %c0_i32, %c0_i32_0 : i32, i32
  }
  func.func @transform_1(%arg0: i32) -> (i32, i32) {
    %c0_i32 = arith.constant 0 : i32
    %c0_i32_0 = arith.constant 0 : i32
    %c0_i32_1 = arith.constant 0 : i32
    return %c0_i32, %c0_i32_0 : i32, i32
  }
  func.func @transform_2(%arg0: i32) -> (i32, i32) {
    %c0_i32 = arith.constant 0 : i32
    %c0_i32_0 = arith.constant 0 : i32
    %c0_i32_1 = arith.constant 0 : i32
    return %c0_i32, %c0_i32_0 : i32, i32
  }
  func.func @transform_3(%arg0: i32) -> (i32, i32) {
    %c0_i32 = arith.constant 0 : i32
    %c0_i32_0 = arith.constant 0 : i32
    %c0_i32_1 = arith.constant 0 : i32
    return %c0_i32, %c0_i32_0 : i32, i32
  }
  func.func @transform_4(%arg0: i32) -> (i32, i32, i32, i32) {
    %c0_i32 = arith.constant 0 : i32
    %c0_i32_0 = arith.constant 0 : i32
    %c0_i32_1 = arith.constant 0 : i32
    %c0_i32_2 = arith.constant 0 : i32
    return %arg0, %c0_i32, %c0_i32_0, %c0_i32_1 : i32, i32, i32, i32
  }
  func.func @transform_5(%arg0: i32) -> (i32, i32, i32) {
    %c0_i32 = arith.constant 0 : i32
    %c0_i32_0 = arith.constant 0 : i32
    %c0_i32_1 = arith.constant 0 : i32
    return %arg0, %c0_i32, %c0_i32_0 : i32, i32, i32
  }
  func.func @transform_6(%arg0: i32) -> (i32, i32, i32, i32) {
    %c0_i32 = arith.constant 0 : i32
    %c0_i32_0 = arith.constant 0 : i32
    %c0_i32_1 = arith.constant 0 : i32
    %c0_i32_2 = arith.constant 0 : i32
    return %arg0, %c0_i32, %c0_i32_0, %c0_i32_1 : i32, i32, i32, i32
  }
  func.func @transform_7(%arg0: i32) -> (i32, i32, i32) {
    %c0_i32 = arith.constant 0 : i32
    %c0_i32_0 = arith.constant 0 : i32
    %c0_i32_1 = arith.constant 0 : i32
    return %arg0, %c0_i32, %c0_i32_0 : i32, i32, i32
  }
}

</mosaic_0001>

<bundles_post_ra>
// kernel: tpu_custom_call.1
= control target key start
LH: loop header
LB: loop body
LE: loop exit
PB: predicated region body
PF: predicated region fallthrough
CT: control target
= control target key end

     0   :  { %s2270_s0 = inlined_call_operand.hbm [shape: f32[29,16], index: 0, kind: input, shape index: {}]   ;;  %s2271_s1 = inlined_call_operand.hbm [shape: f32[16,29], index: 1, kind: input, shape index: {}]   ;;  %s2272_s2 = inlined_call_operand.hbm [shape: f32[29,16], index: 2, kind: input, shape index: {}]   ;;  %s2273_s3 = inlined_call_operand.hbm [shape: f32[16,29], index: 3, kind: input, shape index: {}]   ;;  %s2274_s4 = inlined_call_operand.hbm [shape: f32[2,3,16,16], index: 4, kind: input, shape index: {}]   ;;  %s2275_s5 = inlined_call_operand.hbm [shape: s32[2,16,16], index: 5, kind: input, shape index: {}]   ;;  %s2276_s6 = inlined_call_operand.hbm [shape: f32[2,3,29,29], index: 6, kind: output, shape index: {0}]   ;;  %s2277_s7 = inlined_call_operand.hbm [shape: s32[2,29,29], index: 7, kind: output, shape index: {1}]  }
   0x1   :  { %2295 = sst [smem:[#allocation24_spill]] %s2270_s0 }
   0x2   :  { %2296 = sst [smem:[#allocation25_spill]] %s2271_s1 }
   0x3   :  { %2297 = sst [smem:[#allocation26_spill]] %s2274_s4 }
   0x4   :  { %13 = vsyncpa [#allocation3], 0 }
   0x5   :  { %14 = vsyncpa [#allocation6], 0 }
   0x6   :  { %15 = vsyncpa [#allocation9], 0 }
   0x7   :  { %16 = vsyncpa [#allocation4], 0 }
   0x8   :  { %18 = vsyncpa [#allocation4 + $0x1], 0 }
   0x9   :  { %19 = vsyncpa [#allocation14], 0 }
   0xa   :  { %21 = vsyncpa [#allocation14 + $0x1], 0  ;;  %s1838_s24 = smov 0   ;;  %s1840_s25 = smov 0  }
   0xb   :  { %s1842_s26 = smov 0   ;;  %s1844_s27 = smov 0  }
   0xc LB: > { %s1859_s28 = sadd.s32 4294967295, %s1784_s27   ;;  %s1204_s29 = sadd.s32 4294967294, %s1784_s27   ;;  %s1784_s27 = sphi %s1844_s27, %s2331_s27   ;;  %s1780_s26 = sphi %s1842_s26, %s2335_s26   ;;  %s1776_s25 = sphi %s1840_s25, %s2334_s25   ;;  %s1772_s24 = sphi %s1838_s24, %s2333_s24  }
   0xd   : > { %p131_p0 = scmp.ne.s32.totalorder %s1776_s25, %s1772_s24  ;;  %p2278_p1 = scmp.eq.s32.totalorder %s1859_s28, 0 }
   0xe   : > { %p187_p3 = scmp.eq.s32.totalorder %s1204_s29, 1  ;;  %p1205_p5 = scmp.ge.s32.totalorder %s1784_s27, 1 }
   0xf   : > { %p1868_p4 = por %p2278_p1, %p131_p0  ;;  %p220_p7 = scmp.lt.s32.totalorder %s1784_s27, 3 }
  0x10   : > { %p1873_p6 = por %p187_p3, %p131_p0  ;;  %s1786_s10 = smov [#allocation2]  }
  0x11   : > { %s2298_s30 = scalar_select %p1868_p4, 1, 0 }
  0x12   : > { %s2299_s8 = scalar_select %p1873_p6, 1, 0 }
  0x13   : > { %p1878_p8 = pnand %p1205_p5, %p220_p7  ;;  %s232_s11 = sshll.u32 %s1786_s10, 4  ;;  %s1882_s11 = int_to_ptr.vmem [resolvable:$true] %s232_s11 }
  0x14   : > { %2300 = sst [smem:[#allocation21_spill]] %s2299_s8  ;;  %s1787_s13 = smov [#allocation5]  }
  0x15   : > { %s2301_s9 = scalar_select %p1878_p8, 1, 0 }
  0x16   : > { %p1425_p9 = pneg %p1878_p8  ;;  %s245_s14 = sshll.u32 %s1787_s13, 4  ;;  %s1893_s14 = int_to_ptr.vmem [resolvable:$true] %s245_s14 }
  0x17   : > { %s2303_s0 = sld [smem:[#allocation24_spill]] }
  0x18   : > { %p1889_p11 = pnand %p1425_p9, %p2278_p1 }
  0x1a   : > { %s2302_s12 = scalar_select %p1889_p11, 1, 0 }
  0x1b   : > { %p1903_p13 = pneg %p1889_p11 }
  0x1d   : > { %s1502_s17 = scalar_lea.hbm %s2303_s0, 512 }
  0x1e   : > { %p1503_p12 = scmp.ne.s32.totalorder %s2303_s0, %s1502_s17  ;;  %p1509_p5 = scmp.lt.u32.totalorder %s1502_s17, %s2303_s0 }
  0x20   : > { %p1505_p0 = pnand %p1903_p13, %p1503_p12 }
  0x22   : > { %p1506_p3 = pneg %p1505_p0 }
  0x24   : > { %p1511_p7 = pnand %p1509_p5, %p1506_p3 }
  0x26   : > { %1514 = shalt.err (!%p1511_p7)
}
  0x27   : > { %s1515_s23 = scalar_lea.vmem %s1882_s11, 512  ;;  %p1523_p2 = scmp.lt.s32.totalorder %s1882_s11, %s1882_s11 }
  0x28   : > { %p1516_p9 = scmp.ne.s32.totalorder %s1882_s11, %s1515_s23  ;;  %p1524_p6 = scmp.lt.s32.totalorder %s1515_s23, %s1515_s23 }
  0x2a   : > { %p1518_p10 = pnand %p1516_p9, %p1903_p13  ;;  %p1525_p12 = por %p1524_p6, %p1523_p2 }
  0x2c   : > { %p1519_p1 = pneg %p1518_p10 }
  0x2e   : > { %p1526_p0 = pnand %p1525_p12, %p1519_p1 }
  0x30   : > { %1529 = shalt.err (!%p1526_p0)
}
  0x31   : > { %s2279_s29 = smov 128   ;;  %s2281_s10 = smov 8  }
  0x32   : > { %1428 = dma.hbm_to_vmem [thread:$0]  (!%p1889_p11), %s2303_s0, 512, %s1882_s11, [#allocation3], %s2279_s29, %s2279_s29, %s2281_s10  }
  0x33   : > { %s2305_s1 = sld [smem:[#allocation25_spill]] }
  0x39   : > { %s1530_s18 = scalar_lea.hbm %s2305_s1, 256 }
  0x3a   : > { %p1531_p1 = scmp.ne.s32.totalorder %s2305_s1, %s1530_s18  ;;  %p1537_p10 = scmp.lt.u32.totalorder %s1530_s18, %s2305_s1 }
  0x3c   : > { %p1533_p2 = pnand %p1531_p1, %p1903_p13 }
  0x3e   : > { %p1534_p6 = pneg %p1533_p2 }
  0x40   : > { %p1539_p3 = pnand %p1537_p10, %p1534_p6 }
  0x42   : > { %1542 = shalt.err (!%p1539_p3)
}
  0x43   : > { %s1543_s11 = scalar_lea.vmem %s1893_s14, 256  ;;  %p1551_p12 = scmp.lt.s32.totalorder %s1893_s14, %s1893_s14 }
  0x44   : > { %p1544_p5 = scmp.ne.s32.totalorder %s1893_s14, %s1543_s11  ;;  %p1552_p0 = scmp.lt.s32.totalorder %s1543_s11, %s1543_s11 }
  0x46   : > { %p1546_p7 = pnand %p1544_p5, %p1903_p13  ;;  %p1553_p1 = por %p1552_p0, %p1551_p12 }
  0x48   : > { %p1547_p9 = pneg %p1546_p7 }
  0x4a   : > { %p1554_p2 = pnand %p1553_p1, %p1547_p9 }
  0x4c   : > { %1557 = shalt.err (!%p1554_p2)
}
  0x4d   : > { %1431 = dma.hbm_to_vmem [thread:$0]  (!%p1889_p11), %s2305_s1, 256, %s1893_s14, [#allocation6], %s2279_s29, %s2279_s29, %s2281_s10  }
  0x4e   : > { %s1954_s16 = sadd.s32 1, %s1784_s27   ;;  %s118_s17 = sadd.s32 1, %s1780_s26 }
  0x4f   : > { %2306 = sst [smem:[#allocation22_spill]] %s1954_s16  ;;  %s115_s18 = ssub.s32 %s1784_s27, %s1954_s16 }
  0x50   : > { %p125_p6 = scmp.ne.s32.totalorder %s1780_s26, %s1776_s25  ;;  %p116_p10 = scmp.eq.s32.totalorder %s115_s18, 0 }
  0x51   : > { %p126_p3 = scmp.eq.s32.totalorder %s1784_s27, 0  ;;  %p2307_p5 = scmp.eq.s32.totalorder %s1859_s28, 1 }
  0x52   : > { %p1456_p9 = scmp.lt.s32.totalorder %s1784_s27, 2  ;;  %s285_s22 = sand.u32 1, %s1784_s27  }
  0x53   : > { %p1964_p7 = por %p2307_p5, %p125_p6  ;;  %p127_p12 = por %p126_p3, %p125_p6 }
  0x54   : > { %s1970_s21 = scalar_select %p116_p10, %s1780_s26, %s118_s17  }
  0x55   : > { %s2308_s19 = scalar_select %p1964_p7, 1, 0 }
  0x56   : > { %2309 = sst [smem:[#allocation23_spill]] %s1970_s21  ;;  %s2283_s23 = sand.u32 1, %s1780_s26  }
  0x57   : > { %s1384_s14 = smul.u32 48, %s2283_s23  ;;  %p1976_p0 = pnand %p1456_p9, %p127_p12 }
  0x58   : > { %s1385_s13 = smul.u32 768, %s1784_s27  ;;  %s2311_s4 = sld [smem:[#allocation26_spill]] }
  0x59   : > { %s2310_s11 = scalar_select %p1976_p0, 1, 0 }
  0x5a   : > { %s289_s17 = scalar_lea.vmem [#allocation10], %s1384_s14  ;;  %s1790_s23 = smov [#allocation7]  }
  0x5b   : > { %s296_s10 = sshll.u32 %s289_s17, 4  ;;  %s1988_s0 = sshll.u32 %s1790_s23, 4  ;;  %s1986_s10 = int_to_ptr.vmem [resolvable:$true] %s296_s10  ;;  %s259_s0 = int_to_ptr.vmem [resolvable:$true] %s1988_s0 }
  0x5c   : > { %s1990_s1 = scalar_lea.sflag [#allocation3], %s285_s22  ;;  %p2291_p2 = pneg %p1976_p0 }
  0x5e   : > { %s1984_s29 = scalar_lea.hbm %s2311_s4, %s1385_s13  ;;  %s1563_s14 = scalar_lea.hbm %s2311_s4, 1536 }
  0x5f   : > { %s1558_s21 = scalar_lea.hbm %s1984_s29, 768  ;;  %p1564_p3 = scmp.lt.u32.totalorder %s1984_s29, %s2311_s4 }
  0x60   : > { %p1559_p1 = scmp.ne.s32.totalorder %s1984_s29, %s1558_s21  ;;  %p1565_p5 = scmp.lt.u32.totalorder %s1563_s14, %s1558_s21 }
  0x61   : > { %p1567_p12 = scmp.lt.u32.totalorder %s1558_s21, %s1984_s29 }
  0x62   : > { %p1561_p6 = pnand %p2291_p2, %p1559_p1  ;;  %p1566_p9 = por %p1565_p5, %p1564_p3 }
  0x64   : > { %p1562_p10 = pneg %p1561_p6  ;;  %p1568_p7 = por %p1567_p12, %p1566_p9 }
  0x66   : > { %p1569_p4 = pnand %p1568_p7, %p1562_p10 }
  0x68   : > { %1572 = shalt.err (!%p1569_p4)
}
  0x69   : > { %s1573_s22 = scalar_lea.vmem %s1986_s10, 768  ;;  %s1791_s23 = smov [#allocation10]  }
  0x6a   : > { %p1574_p1 = scmp.ne.s32.totalorder %s1986_s10, %s1573_s22  ;;  %s1578_s13 = sshll.u32 %s1791_s23, 4  ;;  %s1579_s13 = int_to_ptr.vmem [resolvable:$false] %s1578_s13 }
  0x6b   : > { %s1580_s15 = scalar_lea.vmem %s1579_s13, 1536  ;;  %p1581_p11 = scmp.lt.s32.totalorder %s1986_s10, %s1579_s13 }
  0x6c   : > { %p1576_p6 = pnand %p1574_p1, %p2291_p2  ;;  %p1582_p3 = scmp.lt.s32.totalorder %s1580_s15, %s1573_s22 }
  0x6e   : > { %p1577_p8 = pneg %p1576_p6  ;;  %p1583_p5 = por %p1582_p3, %p1581_p11 }
  0x70   : > { %p1584_p9 = pnand %p1583_p5, %p1577_p8 }
  0x72   : > { %1587 = shalt.err (!%p1584_p9)
}
  0x73   : > { %s2312_s21 = smov 8   ;;  %s2313_s14 = smov 128  }
  0x74   : > { %1441 = dma.hbm_to_vmem [thread:$0]  (!%p1976_p0), %s1984_s29, 768, %s1986_s10, %s1990_s1, %s2313_s14, %s2313_s14, %s2312_s21  }
  0x75   : > { %s1588_s23 = scalar_lea.hbm %s2272_s2, 512 }
  0x76   : > { %p1589_p4 = scmp.ne.s32.totalorder %s2272_s2, %s1588_s23  ;;  %p1595_p7 = scmp.lt.u32.totalorder %s1588_s23, %s2272_s2 }
  0x78   : > { %p1591_p8 = pnand %p1589_p4, %p1903_p13 }
  0x7a   : > { %p1592_p11 = pneg %p1591_p8 }
  0x7c   : > { %p1597_p10 = pnand %p1595_p7, %p1592_p11 }
  0x7e   : > { %1600 = shalt.err (!%p1597_p10)
}
  0x7f   : > { %s1601_s16 = scalar_lea.vmem %s259_s0, 512  ;;  %p1609_p3 = scmp.lt.s32.totalorder %s259_s0, %s259_s0 }
  0x80   : > { %p1602_p12 = scmp.ne.s32.totalorder %s259_s0, %s1601_s16  ;;  %p1610_p5 = scmp.lt.s32.totalorder %s1601_s16, %s1601_s16 }
  0x82   : > { %p1604_p1 = pnand %p1602_p12, %p1903_p13  ;;  %p1611_p9 = por %p1610_p5, %p1609_p3 }
  0x84   : > { %p1605_p6 = pneg %p1604_p1 }
  0x86   : > { %p1612_p2 = pnand %p1611_p9, %p1605_p6 }
  0x88   : > { %1615 = shalt.err (!%p1612_p2)
}
  0x89   : > { %p2314_p4 = scmp.ne.s32.totalorder %s2302_s12, 0  ;;  %s1792_s10 = smov [#allocation8]  }
  0x8a   : > { %s271_s18 = sshll.u32 %s1792_s10, 4  ;;  %s2315_s17 = sand.u32 1, %s1780_s26   ;;  %s272_s18 = int_to_ptr.vmem [resolvable:$true] %s271_s18 }
  0x8b   : > { %1434 = dma.hbm_to_vmem [thread:$0]  (!%p2314_p4), %s2272_s2, 512, %s259_s0, [#allocation6], %s2313_s14, %s2313_s14, %s2312_s21  }
  0x8c   : > { %s1212_s23 = sshll.u32 %s2315_s17, 4  ;;  %s1616_s13 = scalar_lea.hbm %s2273_s3, 256 }
  0x8d   : > { %p1617_p2 = scmp.ne.s32.totalorder %s2273_s3, %s1616_s13  ;;  %p1623_p7 = scmp.lt.u32.totalorder %s1616_s13, %s2273_s3 }
  0x8f   : > { %p1619_p8 = pnand %p1617_p2, %p1903_p13 }
  0x91   : > { %p1620_p11 = pneg %p1619_p8 }
  0x93   : > { %p1625_p10 = pnand %p1623_p7, %p1620_p11 }
  0x95   : > { %1628 = shalt.err (!%p1625_p10)
}
  0x96   : > { %s1629_s0 = scalar_lea.vmem %s272_s18, 256  ;;  %p1637_p3 = scmp.lt.s32.totalorder %s272_s18, %s272_s18 }
  0x97   : > { %p1630_p12 = scmp.ne.s32.totalorder %s272_s18, %s1629_s0  ;;  %p1638_p5 = scmp.lt.s32.totalorder %s1629_s0, %s1629_s0 }
  0x99   : > { %p1632_p1 = pnand %p1630_p12, %p1903_p13  ;;  %p1639_p9 = por %p1638_p5, %p1637_p3 }
  0x9b   : > { %p1633_p6 = pneg %p1632_p1 }
  0x9d   : > { %p1640_p0 = pnand %p1639_p9, %p1633_p6 }
  0x9f   : > { %1643 = shalt.err (!%p1640_p0)
}
  0xa0   : > { %1437 = dma.hbm_to_vmem [thread:$0]  (!%p2314_p4), %s2273_s3, 256, %s272_s18, [#allocation9], %s2313_s14, %s2313_s14, %s2312_s21  }
  0xa1   : > { %s1260_s17 = sshll.u32 %s1784_s27, 8  ;;  %s310_s20 = scalar_lea.vmem [#allocation11], %s1212_s23 }
  0xa2   : > { %s317_s16 = sshll.u32 %s310_s20, 4  ;;  %s2070_s15 = scalar_lea.hbm %s2275_s5, %s1260_s17  ;;  %s2072_s16 = int_to_ptr.vmem [resolvable:$true] %s317_s16 }
  0xa3   : > { %s1644_s12 = scalar_lea.hbm %s2070_s15, 256  ;;  %p2316_p0 = scmp.ne.s32.totalorder %s2310_s11, 0 }
  0xa4   : > { %p1645_p13 = scmp.ne.s32.totalorder %s2070_s15, %s1644_s12  ;;  %s1649_s4 = scalar_lea.hbm %s2275_s5, 512 }
  0xa5   : > { %p2317_p2 = pneg %p2316_p0  ;;  %p1650_p11 = scmp.lt.u32.totalorder %s2070_s15, %s2275_s5 }
  0xa6   : > { %p1651_p7 = scmp.lt.u32.totalorder %s1649_s4, %s1644_s12  ;;  %p1653_p12 = scmp.lt.u32.totalorder %s1644_s12, %s2070_s15 }
  0xa7   : > { %p1647_p8 = pnand %p1645_p13, %p2317_p2 }
  0xa8   : > { %p1652_p10 = por %p1651_p7, %p1650_p11 }
  0xa9   : > { %p1648_p4 = pneg %p1647_p8 }
  0xaa   : > { %p1654_p1 = por %p1653_p12, %p1652_p10 }
  0xac   : > { %p1655_p6 = pnand %p1654_p1, %p1648_p4 }
  0xae   : > { %1658 = shalt.err (!%p1655_p6)
}
  0xaf   : > { %s1659_s8 = scalar_lea.vmem %s2072_s16, 256  ;;  %p2318_p5 = pmov %p2317_p2 }
  0xb0   : > { %p1660_p3 = scmp.ne.s32.totalorder %s2072_s16, %s1659_s8  ;;  %s1793_s10 = smov [#allocation11]  }
  0xb1   : > { %s1664_s17 = sshll.u32 %s1793_s10, 4  ;;  %s1665_s17 = int_to_ptr.vmem [resolvable:$false] %s1664_s17 }
  0xb2   : > { %p1662_p9 = pnand %p1660_p3, %p2318_p5  ;;  %s1666_s20 = scalar_lea.vmem %s1665_s17, 512 }
  0xb3   : > { %p1667_p2 = scmp.lt.s32.totalorder %s2072_s16, %s1665_s17  ;;  %p1668_p8 = scmp.lt.s32.totalorder %s1666_s20, %s1659_s8 }
  0xb4   : > { %p1663_p13 = pneg %p1662_p9 }
  0xb5   : > { %p1669_p11 = por %p1668_p8, %p1667_p2 }
  0xb7   : > { %p1670_p7 = pnand %p1669_p11, %p1663_p13 }
  0xb9   : > { %1673 = shalt.err (!%p1670_p7)
}
  0xba   : > { %1444 = dma.hbm_to_vmem [thread:$0]  (!%p2316_p0), %s2070_s15, 256, %s2072_s16, %s1990_s1, %s2313_s14, %s2313_s14, %s2312_s21  }
  0xbb   : > { %p2319_p4 = scmp.ne.s32.totalorder %s2301_s9, 0 }
  0xbc   : > { %p2320_p10 = scmp.eq.s32.totalorder (!%p2319_p4), %s1859_s28, 0 }
  0xbd   : > { %329 = sbr.rel (%p2319_p4) target bundleno = 902 (0x386), region = 44 }
  0xc4   : > { %1747 = dma.done.wait (%p2320_p10), [#allocation3], 512   ;;  %p2321_p12 = pmov %p2320_p10 }
  0xc5   : > { %p2322_p1 = pmov %p2320_p10 }
  0xc6   : > { %1749 = vsyncadd (%p2321_p12), [#allocation3], 4294966784 }
  0xc7   : > { %1751 = dma.done.wait (%p2322_p1), [#allocation6], 768   ;;  %p2323_p6 = pmov %p2322_p1 }
  0xc8   : > { %p2324_p3 = pmov %p2322_p1 }
  0xc9   : > { %1753 = vsyncadd (%p2323_p6), [#allocation6], 4294966528 }
  0xca   : > { %1755 = dma.done.wait (%p2324_p3), [#allocation9], 256   ;;  %p2325_p0 = pmov %p2322_p1 }
  0xcb   : > { %s347_s1 = sand.u32 1, %s1859_s28   ;;  %s2117_s9 = sand.u32 1, %s1776_s25  }
  0xcc   : > { %1757 = vsyncadd (%p2325_p0), [#allocation9], 4294967040  ;;  %s1386_s11 = smul.u32 48, %s2117_s9  ;;  %s348_s21 = scalar_lea.sflag [#allocation3], %s347_s1 }
  0xcd   : > { %p2326_p5 = scmp.ne.s32.totalorder %s2298_s30, 0 }
  0xce   : > { %s351_s14 = scalar_lea.vmem [#allocation10], %s1386_s11 }
  0xcf   : > { %1759 = dma.done.wait (%p2326_p5), %s348_s21, 1024  }
  0xd0   : > { %1761 = vsyncadd (%p2326_p5), %s348_s21, 4294966272  ;;  %vm413_vm0 = vcmask 130048   ;;  %v405_v0 = vld [vmem:[#allocation5] sm:$0xff]  ;;  %v406_v1 = vld [vmem:[#allocation5 + $0x8] sm:$0xff]  ;;  %s1220_s30 = sshll.u32 %s2117_s9, 4  ;;  %s1387_s22 = smul.u32 96, %s2117_s9 }
  0xd1   : > { %v407_v2 = vld [vmem:[%s351_s14] sm:$0xff]  ;;  %v1358_v3 = vpack.c.bf16 %v406_v1, %v405_v0  ;;  %v408_v4 = vld [vmem:[%s351_s14 + $0x8] sm:$0xff]  ;;  %v409_v5 = vld [vmem:[%s351_s14 + $0x10] sm:$0xff]  ;;  %s360_s16 = scalar_lea.vmem [#allocation11], %s1220_s30  ;;  %vm624_vm1 = vcmask 236544   ;;  %vm628_vm2 = vcmask 233472  }
  0xd2   : > { %1302 = vmatprep.mubr.msk.f32.mxu0 %vm413_vm0, %v407_v2  ;;  %v410_v6 = vld [vmem:[%s351_s14 + $0x18] sm:$0xff]  ;;  %v411_v7 = vld [vmem:[%s351_s14 + $0x20] sm:$0xff]  ;;  %v412_v8 = vld [vmem:[%s351_s14 + $0x28] sm:$0xff]  ;;  %s2147_s13 = scalar_lea.vmem [#allocation12], %s1387_s22  ;;  %s1400_s15 = smul.u32 1536, %s1859_s28 }
  0xd3   : > { %1359 = vmatprep.subr.bf16.mxu0 %v1358_v3  ;;  %1382 = vmatprep.subr.bf16.mxu1 %v1358_v3  ;;  %v401_v9 = vld [vmem:[#allocation2] sm:$0xff]  ;;  %v818_v13 = vld [vmem:[#allocation8] sm:$0xff]  ;;  %v819_v14 = vld [vmem:[#allocation8 + $0x8] sm:$0xff]  ;;  %s1025_s12 = sshll.u32 %s2147_s13, 4  ;;  %s1007_s29 = scalar_lea.sflag [#allocation4], %s2117_s9  ;;  %s2183_s12 = int_to_ptr.vmem [resolvable:$true] %s1025_s12 }
  0xd4   : > { %1361 = vmatpush3.bf16.msra.mxu0 %v1358_v3  ;;  %1383 = vmatpush3.bf16.msra.mxu1 %v1358_v3  ;;  %v402_v17 = vld [vmem:[#allocation2 + $0x8] sm:$0xff]  ;;  %v403_v19 = vld [vmem:[#allocation2 + $0x10] sm:$0xff]  ;;  %v1374_v20 = vpack.c.bf16 %v819_v14, %v818_v13  ;;  %v404_v21 = vld [vmem:[#allocation2 + $0x18] sm:$0x1f]  ;;  %s2181_s4 = scalar_lea.hbm %s2276_s6, %s1400_s15  ;;  %s1674_s0 = scalar_lea.vmem %s2183_s12, 1536 }
  0xd5   : > { %1308 = vmatprep.mubr.msk.f32.mxu1 %vm413_vm0, %v411_v7  ;;  %v810_v22 = vld [vmem:[%s360_s16] sm:$0xff]  ;;  %v811_v23 = vld [vmem:[%s360_s16 + $0x8] sm:$0xff]  ;;  %p1675_p9 = scmp.ne.s32.totalorder %s2183_s12, %s1674_s0  ;;  %p2327_p13 = scmp.ne.s32.totalorder %s2308_s19, 0 }
  0xd6   : > { %v812_v24 = vcvt.s32.f32 %v810_v22  ;;  %v813_v25 = vcvt.s32.f32 %v811_v23  ;;  %v814_v29 = vld [vmem:[#allocation7] sm:$0xff]  ;;  %v815_v41 = vld [vmem:[#allocation7 + $0x8] sm:$0xff]  ;;  %v816_v42 = vld [vmem:[#allocation7 + $0x10] sm:$0xff]  ;;  %s1794_s8 = smov [#allocation12]  }
  0xd7   : > { %1303 = vmatmul.mubr.msk.f32.vlgmr.msra.gmra.mrb[0].mxu0 %vm413_vm0, %v408_v4  ;;  %1309 = vmatmul.mubr.msk.f32.vlgmr.msra.gmra.mrb[0].mxu1 %vm413_vm0, %v412_v8  ;;  %v817_v43 = vld [vmem:[#allocation7 + $0x18] sm:$0x1f]  ;;  %p1676_p2 = pnand %p1675_p9, %p2327_p13  ;;  %s1678_s10 = sshll.u32 %s1794_s8, 4  ;;  %s1679_s10 = int_to_ptr.vmem [resolvable:$false] %s1678_s10 }
  0xd8   : > { %1305 = vmatprep.mubr.msk.f32.mxu0 %vm413_vm0, %v409_v5  ;;  %1315 = vmatprep.mubr.msk.f32.mxu1 %vm413_vm0, %v401_v9  ;;  %s1680_s17 = scalar_lea.vmem %s1679_s10, 3072  ;;  %p1681_p11 = scmp.lt.s32.totalorder %s2183_s12, %s1679_s10 }
  0xd9   : > { %p1677_p8 = pneg %p1676_p2  ;;  %p1682_p7 = scmp.lt.s32.totalorder %s1680_s17, %s1674_s0 }
  0xdb   : > { %1306 = vmatmul.mubr.msk.f32.gmra.mrb[2].mxu0 %vm413_vm0, %v410_v6  ;;  %p1683_p4 = por %p1682_p7, %p1681_p11 }
  0xdc   : > { %1335 = vmatprep.mubr.msk.f32.mxu0 %vm413_vm0, %v401_v9 }
  0xdd   : > { %p1684_p10 = pnand %p1683_p4, %p1677_p8 }
 0x1aa   : > { %v1304_v10 = vpop.f32.mrb[0].mxu0  ;;  %v1310_v26 = vpop.f32.mrb[0].mxu1 }
 0x1ab   : > { %v498_v11 = vpop.f32.mrb[1].mxu0  ;;  %v518_v27 = vpop.f32.mrb[1].mxu1 }
 0x1ac   : > { %v1362_v12 = vpack.c.bf16 %v1304_v10, %v498_v11  ;;  %v1370_v28 = vpack.c.bf16 %v1310_v26, %v518_v27 }
 0x1ae   : > { %1363 = vmatprep.subr.bf16.mxu1 %v1362_v12  ;;  %v1307_v15 = vpop.f32.mrb[2].mxu0  ;;  %1371 = vmatprep.subr.bf16.mxu0 %v1370_v28 }
 0x1af   : > { %1365 = vmatpush3.bf16.msra.mxu1 %v1362_v12  ;;  %v508_v16 = vpop.f32.mrb[3].mxu0  ;;  %1373 = vmatpush3.bf16.msra.mxu0 %v1370_v28 }
 0x1b0   : > { %v1366_v18 = vpack.c.bf16 %v1307_v15, %v508_v16 }
 0x1b2   : > { %1316 = vmatmul.mubr.msk.f32.vlgmr.msra.gmra.mrb[2].mxu1 %vm413_vm0, %v402_v17  ;;  %1367 = vmatprep.subr.bf16.mxu1 %v1366_v18 }
 0x1b3   : > { %1318 = vmatprep.mubr.msk.f32.mxu1 %vm413_vm0, %v403_v19  ;;  %1369 = vmatpush3.bf16.msra.mxu1 %v1366_v18 }
 0x1b4   : > { %1375 = vmatprep.subr.bf16.mxu1 %v1374_v20  ;;  %1336 = vmatmul.mubr.msk.f32.vlgmr.msra.gmra.mrb[4].mxu0 %vm413_vm0, %v402_v17 }
 0x1b5   : > { %1338 = vmatprep.mubr.msk.f32.mxu0 %vm413_vm0, %v403_v19 }
 0x1b6   : > { %1319 = vmatmul.mubr.msk.f32.gmra.mrb[4].mxu1 %vm413_vm0, %v404_v21 }
 0x1b7   : > { %1325 = vmatprep.mubr.msk.f32.mxu1 %vm413_vm0, %v401_v9 }
 0x1b8   : > { %1339 = vmatmul.mubr.msk.f32.gmra.mrb[6].mxu0 %vm413_vm0, %v404_v21 }
 0x1b9   : > { %1352 = vmatprep.mubr.msk.f32.mxu0 %vm413_vm0, %v814_v29 }
 0x1ba   : > { %1326 = vmatmul.mubr.msk.f32.vlgmr.msra.gmra.mrb[6].mxu1 %vm413_vm0, %v402_v17 }
 0x1bb   : > { %1328 = vmatprep.mubr.msk.f32.mxu1 %vm413_vm0, %v403_v19  ;;  %1377 = vmatpush3.bf16.msra.mxu1 %v1374_v20 }
 0x1be   : > { %1329 = vmatmul.mubr.msk.f32.gmra.mrb[8].mxu1 %vm413_vm0, %v404_v21 }
 0x1bf   : > { %1345 = vmatprep.mubr.msk.f32.mxu1 %vm413_vm0, %v812_v24 }
 0x1c2   : > { %1346 = vmatmul.mubr.msk.f32.vlgmr.msra.gmra.mrb[10].mxu1 %vm413_vm0, %v813_v25 }
 0x285   : > { %v1317_v30 = vpop.f32.mrb[2].mxu1 }
 0x286   : > { %626 = vst.msk [vmem:[%s2147_s13 + $0x8] sm:$0xff] %vm624_vm1, %v1317_v30  ;;  %v605_v31 = vpop.f32.mrb[3].mxu1 }
 0x287   : > { %625 = vst.msk [vmem:[%s2147_s13] sm:$0xff] %vm624_vm1, %v605_v31  ;;  %v1337_v44 = vpop.f32.mrb[4].mxu0 }
 0x288   : > { %1245 = vst.msk [vmem:[%s2147_s13 + $0x48] sm:$0xff] %vm624_vm1, %v1337_v44  ;;  %v786_v45 = vpop.f32.mrb[5].mxu0 }
 0x289   : > { %v1320_v32 = vpop.f32.mrb[4].mxu1  ;;  %1244 = vst.msk [vmem:[%s2147_s13 + $0x40] sm:$0xff] %vm624_vm1, %v786_v45 }
 0x28a   : > { %629 = vst.msk [vmem:[%s2147_s13 + $0x18] sm:$0x1f] %vm628_vm2, %v1320_v32  ;;  %v615_v33 = vpop.f32.mrb[5].mxu1 }
 0x28b   : > { %627 = vst.msk [vmem:[%s2147_s13 + $0x10] sm:$0xff] %vm624_vm1, %v615_v33  ;;  %v1340_v46 = vpop.f32.mrb[6].mxu0 }
 0x28c   : > { %1247 = vst.msk [vmem:[%s2147_s13 + $0x58] sm:$0x1f] %vm628_vm2, %v1340_v46  ;;  %v796_v47 = vpop.f32.mrb[7].mxu0 }
 0x28d   : > { %v1327_v34 = vpop.f32.mrb[6].mxu1  ;;  %1246 = vst.msk [vmem:[%s2147_s13 + $0x50] sm:$0xff] %vm624_vm1, %v796_v47 }
 0x28e   : > { %1237 = vst.msk [vmem:[%s2147_s13 + $0x28] sm:$0xff] %vm624_vm1, %v1327_v34  ;;  %v696_v35 = vpop.f32.mrb[7].mxu1 }
 0x28f   : > { %1236 = vst.msk [vmem:[%s2147_s13 + $0x20] sm:$0xff] %vm624_vm1, %v696_v35 }
 0x291   : > { %v1330_v36 = vpop.f32.mrb[8].mxu1 }
 0x292   : > { %1239 = vst.msk [vmem:[%s2147_s13 + $0x38] sm:$0x1f] %vm628_vm2, %v1330_v36  ;;  %v706_v37 = vpop.f32.mrb[9].mxu1 }
 0x293   : > { %1238 = vst.msk [vmem:[%s2147_s13 + $0x30] sm:$0xff] %vm624_vm1, %v706_v37 }
 0x295   : > { %v1347_v38 = vpop.f32.mrb[10].mxu1 }
 0x296   : > { %v892_v39 = vpop.f32.mrb[11].mxu1 }
 0x297   : > { %v1378_v40 = vpack.c.bf16 %v1347_v38, %v892_v39 }
 0x299   : > { %1379 = vmatprep.subr.bf16.mxu0 %v1378_v40 }
 0x29a   : > { %1381 = vmatpush3.bf16.msra.mxu0 %v1378_v40 }
 0x29d   : > { %1353 = vmatmul.mubr.msk.f32.vlgmr.msra.gmra.mrb[8].mxu0 %vm413_vm0, %v815_v41 }
 0x29e   : > { %1355 = vmatprep.mubr.msk.f32.mxu0 %vm413_vm0, %v816_v42 }
 0x2a1   : > { %1356 = vmatmul.mubr.msk.f32.gmra.mrb[10].mxu0 %vm413_vm0, %v817_v43 }
 0x2a2   : > { %1687 = shalt.err (!%p1684_p10)
}
 0x2a3   : > { %s1688_s20 = scalar_lea.hbm %s2181_s4, 1536  ;;  %s1692_s21 = scalar_lea.hbm %s2276_s6, 3072 }
 0x2a4   : > { %p1689_p12 = scmp.ne.s32.totalorder %s2181_s4, %s1688_s20  ;;  %p1693_p3 = scmp.lt.u32.totalorder %s2181_s4, %s2276_s6 }
 0x2a5   : > { %p1694_p0 = scmp.lt.u32.totalorder %s1692_s21, %s1688_s20  ;;  %p1696_p9 = scmp.lt.u32.totalorder %s1688_s20, %s2181_s4 }
 0x2a6   : > { %p1690_p1 = pnand %p1689_p12, %p2327_p13 }
 0x2a7   : > { %p1695_p5 = por %p1694_p0, %p1693_p3 }
 0x2a8   : > { %p1691_p6 = pneg %p1690_p1 }
 0x2a9   : > { %p1697_p2 = por %p1696_p9, %p1695_p5 }
 0x2ab   : > { %p1698_p8 = pnand %p1697_p2, %p1691_p6 }
 0x2ad   : > { %1701 = shalt.err (!%p1698_p8)
}
 0x2ae   : > { %s1795_s16 = smov 128   ;;  %s1796_s22 = smov 8  }
 0x2af   : > { %1421 = dma.vmem_to_hbm [thread:$0]  (%p2327_p13), %s2183_s12, 1536, %s2181_s4, %s1007_s29, %s1795_s16, %s1795_s16, %s1796_s22  }
 0x2b0   : > { %s1221_s13 = sshll.u32 %s2117_s9, 5  ;;  %s1261_s23 = sshll.u32 %s1859_s28, 9 }
 0x2b1   : > { %s400_s15 = scalar_lea.vmem [#allocation13], %s1221_s13  ;;  %s2221_s29 = scalar_lea.hbm %s2277_s7, %s1261_s23 }
 0x2b2   : > { %s1041_s18 = sshll.u32 %s400_s15, 4  ;;  %s1012_s28 = scalar_lea.sflag [#allocation14], %s2117_s9  ;;  %s2216_s18 = int_to_ptr.vmem [resolvable:$true] %s1041_s18 }
 0x2b3   : > { %s1702_s0 = scalar_lea.vmem %s2216_s18, 512  ;;  %s1797_s8 = smov [#allocation13]  }
 0x2b4   : > { %p1703_p11 = scmp.ne.s32.totalorder %s2216_s18, %s1702_s0  ;;  %s1706_s10 = sshll.u32 %s1797_s8, 4  ;;  %s1707_s10 = int_to_ptr.vmem [resolvable:$false] %s1706_s10 }
 0x2b5   : > { %s1708_s17 = scalar_lea.vmem %s1707_s10, 1024  ;;  %p1709_p10 = scmp.lt.s32.totalorder %s2216_s18, %s1707_s10 }
 0x2b6   : > { %p1704_p7 = pnand %p1703_p11, %p2327_p13  ;;  %p1710_p12 = scmp.lt.s32.totalorder %s1708_s17, %s1702_s0 }
 0x2b8   : > { %p1705_p4 = pneg %p1704_p7  ;;  %p1711_p1 = por %p1710_p12, %p1709_p10 }
 0x2ba   : > { %p1712_p6 = pnand %p1711_p1, %p1705_p4 }
 0x370   : > { %v1354_v48 = vpop.f32.mrb[8].mxu0 }
 0x371   : > { %v1393_v49 = vcvt.f32.s32 %v1354_v48  ;;  %v979_v50 = vpop.f32.mrb[9].mxu0 }
 0x372   : > { %v1390_v51 = vcvt.f32.s32 %v979_v50 }
 0x373   : > { %1003 = vst.msk [vmem:[%s400_s15 + $0x8] sm:$0xff] %vm624_vm1, %v1393_v49 }
 0x374   : > { %1002 = vst.msk [vmem:[%s400_s15] sm:$0xff] %vm624_vm1, %v1390_v51  ;;  %v1357_v52 = vpop.f32.mrb[10].mxu0 }
 0x375   : > { %v1399_v53 = vcvt.f32.s32 %v1357_v52  ;;  %v989_v54 = vpop.f32.mrb[11].mxu0 }
 0x376   : > { %v1396_v55 = vcvt.f32.s32 %v989_v54 }
 0x377   : > { %1005 = vst.msk [vmem:[%s400_s15 + $0x18] sm:$0x1f] %vm628_vm2, %v1399_v53 }
 0x378   : > { %1004 = vst.msk [vmem:[%s400_s15 + $0x10] sm:$0xff] %vm624_vm1, %v1396_v55 }
 0x379   : > { %1715 = shalt.err (!%p1712_p6)
}
 0x37a   : > { %s1716_s20 = scalar_lea.hbm %s2221_s29, 512  ;;  %s1720_s21 = scalar_lea.hbm %s2277_s7, 1024 }
 0x37b   : > { %p1717_p3 = scmp.ne.s32.totalorder %s2221_s29, %s1716_s20  ;;  %p1721_p9 = scmp.lt.u32.totalorder %s2221_s29, %s2277_s7 }
 0x37c   : > { %p1722_p2 = scmp.lt.u32.totalorder %s1720_s21, %s1716_s20  ;;  %p1724_p11 = scmp.lt.u32.totalorder %s1716_s20, %s2221_s29 }
 0x37d   : > { %p1718_p0 = pnand %p1717_p3, %p2327_p13 }
 0x37e   : > { %p1723_p8 = por %p1722_p2, %p1721_p9 }
 0x37f   : > { %p1719_p5 = pneg %p1718_p0 }
 0x380   : > { %p1725_p7 = por %p1724_p11, %p1723_p8 }
 0x382   : > { %p1726_p4 = pnand %p1725_p7, %p1719_p5 }
 0x384   : > { %1729 = shalt.err (!%p1726_p4)
}
 0x385   : > { %1422 = dma.vmem_to_hbm [thread:$0]  (%p2327_p13), %s2216_s18, 512, %s2221_s29, %s1012_s28, %s1795_s16, %s1795_s16, %s1796_s22  }
 0x386 PF: > { %s2328_s13 = sld [smem:[#allocation21_spill]]  ;;  %s1056_s15 = sand.u32 1, %s1772_s24  }
 0x387   : > { %p2330_p12 = scmp.ge.s32.totalorder %s1784_s27, 2  ;;  %s1057_s23 = scalar_lea.sflag [#allocation4], %s1056_s15 }
 0x38c   : > { %p2329_p10 = scmp.ne.s32.totalorder %s2328_s13, 0 }
 0x38e   : > { %p1446_p1 = pnand %p2330_p12, %p2329_p10 }
 0x390   : > { %1763 = dma.done.wait (!%p1446_p1), %s1057_s23, 1536  }
 0x391   : > { %1765 = vsyncadd (!%p1446_p1), %s1057_s23, 4294965760  ;;  %s1066_s19 = scalar_lea.sflag [#allocation14], %s1056_s15 }
 0x392   : > { %1767 = dma.done.wait (!%p1446_p1), %s1066_s19, 512  }
 0x393   : > { %1769 = vsyncadd (!%p1446_p1), %s1066_s19, 4294966784  ;;  %s2331_s27 = sld [smem:[#allocation22_spill]]  ;;  %s2332_s9 = sld [smem:[#allocation23_spill]] }
 0x394   : > { %s2333_s24 = smov %s1776_s25  ;;  %s2334_s25 = smov %s1780_s26 }
 0x399   : > { %p24_p13 = scmp.ge.s32.totalorder %s2331_s27, 4   ;;  %s2335_s26 = smov %s2332_s9 }
 0x39b   :  { %26 = sbr.rel (!%p24_p13) target bundleno = 12 (0xc), region = 134 }
 0x3a2   :  { %1071 = vsyncpa [#allocation3], 1 }
 0x3a3   :  { %1073 = vsyncpa [#allocation3 + $0x1], 1 }
 0x3a4   :  { %1074 = vsyncpa [#allocation6], 1 }
 0x3a5   :  { %1075 = vsyncpa [#allocation9], 1 }
 0x3a6   :  { %1076 = vsyncpa [#allocation4], 1 }
 0x3a7   :  { %1078 = vsyncpa [#allocation4 + $0x1], 1 }
 0x3a8   :  { %1079 = vsyncpa [#allocation14], 1 }
 0x3a9   :  { %1081 = vsyncpa [#allocation14 + $0x1], 1 }

</bundles_post_ra>
